<compile_context>
chip_gen: v6e
topology: v6e:2x2x1
jax: 0.10.0
libtpu: 0.0.40
codegen_flags: <defaults>
</compile_context>

<pallas_src>
import functools
import math

import jax
import jax.numpy as jnp
from jax.experimental import pallas as pl
from jax.experimental.pallas import tpu as pltpu


_BN_EPS = 1e-5
_LANE = 128
# Safe scoped-VMEM limit on every generation (v5e default is only 16 MiB;
# v6e/v7x default is 32 MiB). Tiles here stay well below this.
_VMEM_LIMIT = 32 * 1024 * 1024


def _round_up(n, m):
    return ((n + m - 1) // m) * m


# ----------------------------------------------------------------------------
# Pallas kernels
# ----------------------------------------------------------------------------
def _proj_kernel(x_ref, wl_ref, wr_ref, b_ref, zl_ref, zr_ref):
    """Per-layer projection pre-pass: zl = x@Wl', zr = x@Wr' + b'."""
    x = x_ref[...]
    zl_ref[...] = jnp.dot(
        x, wl_ref[...], preferred_element_type=jnp.float32).astype(zl_ref.dtype)
    zr_ref[...] = (jnp.dot(x, wr_ref[...], preferred_element_type=jnp.float32)
                   + b_ref[...]).astype(zr_ref.dtype)


def _agg_kernel(activation, num_valid, a_ref, zl_ref, zr_ref, inv_ref,
                o_ref, acc_ref):
    """K-tiled acc += A01 @ zl; epilogue: inv_deg*acc + zr, then activation."""
    k = pl.program_id(1)

    @pl.when(k == 0)
    def _():
        acc_ref[...] = jnp.zeros_like(acc_ref)

    acc_ref[...] += jnp.dot(a_ref[...], zl_ref[...],
                            preferred_element_type=jnp.float32)

    @pl.when(k == pl.num_programs(1) - 1)
    def _():
        # Exact per-row mean scale (f32) + root/self term (BN already folded).
        h = acc_ref[...] * inv_ref[...] + zr_ref[...]
        if activation == "relu":
            o_ref[...] = jnp.maximum(h, 0.0).astype(o_ref.dtype)
        else:  # masked log_softmax over the (zero-padded) class dim
            col = jax.lax.broadcasted_iota(jnp.int32, h.shape, 1)
            h = jnp.where(col < num_valid, h, -jnp.inf)
            m = jnp.max(h, axis=-1, keepdims=True)
            s = h - m
            lse = jnp.log(jnp.sum(jnp.exp(s), axis=-1, keepdims=True))
            o_ref[...] = (s - lse).astype(o_ref.dtype)


# ----------------------------------------------------------------------------
# Layer wrappers (pallas_call plumbing)
# ----------------------------------------------------------------------------
def _project(x, wl, wr, b, *, tm, zr_dtype=jnp.float32):
    n, c_in = x.shape
    c_out = wl.shape[1]
    assert n % tm == 0

    flops = 2 * 2 * n * c_in * c_out
    bytes_acc = (n * c_in * x.dtype.itemsize
                 + n * c_out * (2 + jnp.dtype(zr_dtype).itemsize)
                 + 2 * c_in * c_out * wl.dtype.itemsize)

    return pl.pallas_call(
        _proj_kernel,
        out_shape=(jax.ShapeDtypeStruct((n, c_out), jnp.bfloat16),   # zl
                   jax.ShapeDtypeStruct((n, c_out), zr_dtype)),      # zr
        grid_spec=pltpu.PrefetchScalarGridSpec(
            num_scalar_prefetch=0,
            grid=(n // tm,),
            in_specs=[
                pl.BlockSpec((tm, c_in), lambda i: (i, 0)),      # x
                pl.BlockSpec((c_in, c_out), lambda i: (0, 0)),   # Wl'
                pl.BlockSpec((c_in, c_out), lambda i: (0, 0)),   # Wr'
                pl.BlockSpec((1, c_out), lambda i: (0, 0)),      # b'
            ],
            out_specs=(pl.BlockSpec((tm, c_out), lambda i: (i, 0)),
                       pl.BlockSpec((tm, c_out), lambda i: (i, 0))),
        ),
        compiler_params=pltpu.CompilerParams(
            dimension_semantics=("parallel",),
            vmem_limit_bytes=_VMEM_LIMIT),
        cost_estimate=pl.CostEstimate(flops=flops, transcendentals=0,
                                      bytes_accessed=bytes_acc),
    )(x, wl, wr, b)


def _aggregate(a01, zl, zr, inv_deg, activation, num_valid, out_dtype,
               *, tm, tk):
    n = a01.shape[0]
    c = zl.shape[1]
    assert n % tm == 0 and n % tk == 0

    flops = 2 * n * n * c
    bytes_acc = (n * n * a01.dtype.itemsize            # adjacency (dominant)
                 + (n // tm) * n * c * zl.dtype.itemsize  # zl re-read per row tile
                 + n * c * zr.dtype.itemsize
                 + n * 4                               # inv_deg
                 + n * c * jnp.dtype(out_dtype).itemsize)
    trans = n * c if activation != "relu" else 0

    return pl.pallas_call(
        functools.partial(_agg_kernel, activation, num_valid),
        out_shape=jax.ShapeDtypeStruct((n, c), out_dtype),
        grid_spec=pltpu.PrefetchScalarGridSpec(
            num_scalar_prefetch=0,
            grid=(n // tm, n // tk),
            in_specs=[
                pl.BlockSpec((tm, tk), lambda i, k: (i, k)),   # A01 tile
                pl.BlockSpec((tk, c), lambda i, k: (k, 0)),    # zl
                pl.BlockSpec((tm, c), lambda i, k: (i, 0)),    # zr
                pl.BlockSpec((tm, 1), lambda i, k: (i, 0)),    # inv_deg
            ],
            out_specs=pl.BlockSpec((tm, c), lambda i, k: (i, 0)),
            scratch_shapes=[pltpu.VMEM((tm, c), jnp.float32)],
        ),
        # Row axis parallel (megacore / v7x 2-TC), reduction axis arbitrary.
        compiler_params=pltpu.CompilerParams(
            dimension_semantics=("parallel", "arbitrary"),
            vmem_limit_bytes=_VMEM_LIMIT),
        cost_estimate=pl.CostEstimate(flops=flops, transcendentals=trans,
                                      bytes_accessed=bytes_acc),
    )(a01, zl, zr, inv_deg)


# ----------------------------------------------------------------------------
# One-time graph preparation (pad, exact 0/1 bf16 adjacency, 1/deg scale)
# ----------------------------------------------------------------------------
def prepare_graph(adj, *, tile):
    """adj: dense binary (or nonzero-pattern) adjacency [N, N]."""
    n = adj.shape[0]
    n_pad = _round_up(n, tile)
    mask = (adj != 0)
    a01 = jnp.pad(mask.astype(jnp.bfloat16), ((0, n_pad - n), (0, n_pad - n)))
    deg = jnp.sum(mask, axis=1).astype(jnp.float32)
    inv_deg = 1.0 / jnp.maximum(deg, 1.0)
    inv_deg = jnp.pad(inv_deg, (0, n_pad - n)).reshape(n_pad, 1)
    return dict(a01=a01, inv_deg=inv_deg, n=n, n_pad=n_pad)


# ----------------------------------------------------------------------------
# One-time parameter preparation (BN folding, bf16 casts, class padding)
# ----------------------------------------------------------------------------
def prepare_params(params, *, bn_eps=_BN_EPS, lane=_LANE):
    n_layers = len(params["wl"])
    hidden = []
    for i in range(n_layers - 1):
        scale = params["gamma"][i] * jax.lax.rsqrt(params["rvar"][i] + bn_eps)
        wl = (params["wl"][i] * scale).astype(jnp.bfloat16)
        wr = (params["wr"][i] * scale).astype(jnp.bfloat16)
        b = ((params["b"][i] - params["rmean"][i]) * scale
             + params["beta"][i]).astype(jnp.float32)
        hidden.append((wl, wr, b))

    wl_f, wr_f, b_f = params["wl"][-1], params["wr"][-1], params["b"][-1]
    num_classes = wl_f.shape[1]
    c_pad = _round_up(num_classes, lane)
    pad = ((0, 0), (0, c_pad - num_classes))
    final = (jnp.pad(wl_f, pad).astype(jnp.bfloat16),
             jnp.pad(wr_f, pad).astype(jnp.bfloat16),
             jnp.pad(b_f, pad).astype(jnp.float32),
             num_classes)
    return dict(hidden=hidden, final=final)


# ----------------------------------------------------------------------------
# Full SAGE forward (glue in plain JAX)
# ----------------------------------------------------------------------------
def sage_forward(x, graph, prepared, *, tm=512, tk=512):
    a01, inv_deg = graph["a01"], graph["inv_deg"]
    n, n_pad = graph["n"], graph["n_pad"]
    assert n_pad % tm == 0 and n_pad % tk == 0, "graph tile/pad mismatch"

    if x.shape[0] != n_pad:
        x = jnp.pad(x, ((0, n_pad - x.shape[0]), (0, 0)))
    h = x.astype(jnp.bfloat16)

    for (wl, wr, b) in prepared["hidden"]:
        zl, zr = _project(h, wl, wr, b, tm=tm)
        h = _aggregate(a01, zl, zr, inv_deg, "relu", 0, jnp.bfloat16,
                       tm=tm, tk=tk)
        # dropout: eval mode -> identity

    wl_p, wr_p, b_p, num_classes = prepared["final"]
    zl, zr = _project(h, wl_p, wr_p, b_p, tm=tm)
    out = _aggregate(a01, zl, zr, inv_deg, "log_softmax", num_classes,
                     jnp.float32, tm=tm, tk=tk)
    return out[:n, :num_classes]


def init_params(key, in_channels, hidden_channels, out_channels, num_layers):
    dims = ([in_channels] + [hidden_channels] * (num_layers - 1)
            + [out_channels])
    wl, wr, b = [], [], []
    gamma, beta, rmean, rvar = [], [], [], []
    for li in range(num_layers):
        c_in, c_out = dims[li], dims[li + 1]
        key, k1, k2 = jax.random.split(key, 3)
        scale = 1.0 / jnp.sqrt(jnp.float32(c_in))
        wl.append(jax.random.uniform(k1, (c_in, c_out), jnp.float32,
                                     -scale, scale))
        wr.append(jax.random.uniform(k2, (c_in, c_out), jnp.float32,
                                     -scale, scale))
        b.append(jnp.zeros((1, c_out), jnp.float32))
        if li < num_layers - 1:
            gamma.append(jnp.ones((1, c_out), jnp.float32))
            beta.append(jnp.zeros((1, c_out), jnp.float32))
            rmean.append(jnp.zeros((1, c_out), jnp.float32))
            rvar.append(jnp.ones((1, c_out), jnp.float32))
    return dict(wl=wl, wr=wr, b=b, gamma=gamma, beta=beta,
                rmean=rmean, rvar=rvar)


# ----------------------------------------------------------------------------
# Pure-JAX reference (f32, unfolded) for a sanity check
# ----------------------------------------------------------------------------
def sage_reference(x, a_norm, params):
    n_layers = len(params["wl"])
    for i in range(n_layers - 1):
        h = a_norm @ x @ params["wl"][i] + x @ params["wr"][i] + params["b"][i]
        inv = jax.lax.rsqrt(params["rvar"][i] + _BN_EPS)
        h = params["gamma"][i] * (h - params["rmean"][i]) * inv \
            + params["beta"][i]
        x = jnp.maximum(h, 0.0)
    h = a_norm @ x @ params["wl"][-1] + x @ params["wr"][-1] + params["b"][-1]
    return jax.nn.log_softmax(h, axis=-1)


if __name__ == "__main__":
    # Small deterministic problem. N is not a tile multiple (exercises padding)
    # and is larger than one tile so the K-tiled accumulator path (grid 3x3)
    # and the "parallel" row axis are actually exercised.
    key = jax.random.PRNGKey(0)
    k_x, k_adj, k_p = jax.random.split(key, 3)

    N, C_IN, HID, C_OUT, NUM_LAYERS = 700, 64, 128, 10, 3
    TM = TK = 256   # small-shape test tiles; production default is 512

    x = jax.random.normal(k_x, (N, C_IN), jnp.float32)
    adj = (jax.random.uniform(k_adj, (N, N)) < 0.05).astype(jnp.float32)

    params = init_params(k_p, C_IN, HID, C_OUT, NUM_LAYERS)
    prepared = prepare_params(params)
    graph = prepare_graph(adj, tile=math.lcm(TM, TK))   # one-time A prep

    out = sage_forward(x, graph, prepared, tm=TM, tk=TK)
    out = jax.block_until_ready(out)

    # Reference uses the classic row-normalized dense adjacency.
    deg = jnp.sum(adj, axis=1, keepdims=True)
    a_norm = adj / jnp.maximum(deg, 1.0)
    ref = sage_reference(x, a_norm, params)

    assert out.shape == (N, C_OUT)
    max_err = float(jnp.max(jnp.abs(out - ref)))
    # bf16 matmul operands (exact 0/1 adjacency, f32 accumulation) -> small err
    assert jnp.allclose(out, ref, atol=5e-2, rtol=5e-2), \
        f"mismatch vs reference (max abs err {max_err})"

    print("KERNEL_OK")
</pallas_src>

<mosaic_0001>
module attributes {stable_mosaic.version = 11 : i64} {
  func.func @_proj_kernel(%arg0: i32, %arg1: memref<256x64xbf16, #tpu.memory_space<vmem>>, %arg2: memref<64x128xbf16, #tpu.memory_space<vmem>>, %arg3: memref<64x128xbf16, #tpu.memory_space<vmem>>, %arg4: memref<1x128xf32, #tpu.memory_space<vmem>>, %arg5: memref<256x128xbf16, #tpu.memory_space<vmem>>, %arg6: memref<256x128xf32, #tpu.memory_space<vmem>>) attributes {dimension_semantics = [#tpu.dimension_semantics<parallel>], iteration_bounds = array<i64: 3>, scalar_prefetch = 0 : i64, scratch_operands = 0 : i64, tpu.core_type = #tpu.core_type<tc>, window_params = [{transform_indices = @transform_0, window_bounds = array<i64: 256, 64>}, {pipeline_mode = #tpu.pipeline_mode<synchronous>, transform_indices = @transform_1, window_bounds = array<i64: 64, 128>}, {pipeline_mode = #tpu.pipeline_mode<synchronous>, transform_indices = @transform_2, window_bounds = array<i64: 64, 128>}, {pipeline_mode = #tpu.pipeline_mode<synchronous>, transform_indices = @transform_3, window_bounds = array<i64: 1, 128>}, {transform_indices = @transform_4, window_bounds = array<i64: 256, 128>}, {transform_indices = @transform_5, window_bounds = array<i64: 256, 128>}]} {
    %c0 = arith.constant 0 : index
    %c0_0 = arith.constant 0 : index
    %0 = vector.load %arg1[%c0, %c0_0] : memref<256x64xbf16, #tpu.memory_space<vmem>>, vector<256x64xbf16>
    %c0_1 = arith.constant 0 : index
    %c0_2 = arith.constant 0 : index
    %1 = vector.load %arg2[%c0_1, %c0_2] : memref<64x128xbf16, #tpu.memory_space<vmem>>, vector<64x128xbf16>
    %cst = arith.constant dense<0.000000e+00> : vector<256x128xf32>
    %2 = tpu.matmul %0, %1, %cst {dimension_numbers = #tpu.dot_dimension_numbers<[1], [0], [0], [1], [0, 0, 1, 1], [], []>} : vector<256x64xbf16>, vector<64x128xbf16>, vector<256x128xf32> -> vector<256x128xf32>
    %3 = arith.truncf %2 : vector<256x128xf32> to vector<256x128xbf16>
    %c0_3 = arith.constant 0 : index
    %c0_4 = arith.constant 0 : index
    %4 = vector.load %arg5[%c0_3, %c0_4] : memref<256x128xbf16, #tpu.memory_space<vmem>>, vector<256x128xbf16>
    tpu.vector_store %arg5[%c0_3, %c0_4], %3 {strides = array<i32>} : memref<256x128xbf16, #tpu.memory_space<vmem>>, vector<256x128xbf16>,
    %c0_5 = arith.constant 0 : index
    %c0_6 = arith.constant 0 : index
    %5 = vector.load %arg3[%c0_5, %c0_6] : memref<64x128xbf16, #tpu.memory_space<vmem>>, vector<64x128xbf16>
    %cst_7 = arith.constant dense<0.000000e+00> : vector<256x128xf32>
    %6 = tpu.matmul %0, %5, %cst_7 {dimension_numbers = #tpu.dot_dimension_numbers<[1], [0], [0], [1], [0, 0, 1, 1], [], []>} : vector<256x64xbf16>, vector<64x128xbf16>, vector<256x128xf32> -> vector<256x128xf32>
    %c0_8 = arith.constant 0 : index
    %c0_9 = arith.constant 0 : index
    %7 = vector.load %arg4[%c0_8, %c0_9] : memref<1x128xf32, #tpu.memory_space<vmem>>, vector<1x128xf32>
    %8 = vector.broadcast %7 : vector<1x128xf32> to vector<256x128xf32>
    %9 = arith.addf %6, %8 : vector<256x128xf32>
    %c0_10 = arith.constant 0 : index
    %c0_11 = arith.constant 0 : index
    %10 = vector.load %arg6[%c0_10, %c0_11] : memref<256x128xf32, #tpu.memory_space<vmem>>, vector<256x128xf32>
    tpu.vector_store %arg6[%c0_10, %c0_11], %9 {strides = array<i32>} : memref<256x128xf32, #tpu.memory_space<vmem>>, vector<256x128xf32>,
    return
  }
  func.func @transform_0(%arg0: i32) -> (i32, i32) {
    %c0_i32 = arith.constant 0 : i32
    %c0_i32_0 = arith.constant 0 : i32
    return %arg0, %c0_i32 : i32, i32
  }
  func.func @transform_1(%arg0: i32) -> (i32, i32) {
    %c0_i32 = arith.constant 0 : i32
    %c0_i32_0 = arith.constant 0 : i32
    %c0_i32_1 = arith.constant 0 : i32
    return %c0_i32, %c0_i32_0 : i32, i32
  }
  func.func @transform_2(%arg0: i32) -> (i32, i32) {
    %c0_i32 = arith.constant 0 : i32
    %c0_i32_0 = arith.constant 0 : i32
    %c0_i32_1 = arith.constant 0 : i32
    return %c0_i32, %c0_i32_0 : i32, i32
  }
  func.func @transform_3(%arg0: i32) -> (i32, i32) {
    %c0_i32 = arith.constant 0 : i32
    %c0_i32_0 = arith.constant 0 : i32
    %c0_i32_1 = arith.constant 0 : i32
    return %c0_i32, %c0_i32_0 : i32, i32
  }
  func.func @transform_4(%arg0: i32) -> (i32, i32) {
    %c0_i32 = arith.constant 0 : i32
    %c0_i32_0 = arith.constant 0 : i32
    return %arg0, %c0_i32 : i32, i32
  }
  func.func @transform_5(%arg0: i32) -> (i32, i32) {
    %c0_i32 = arith.constant 0 : i32
    %c0_i32_0 = arith.constant 0 : i32
    return %arg0, %c0_i32 : i32, i32
  }
}

</mosaic_0001>

<bundles_post_ra>
// kernel: tpu_custom_call.1
= control target key start
LH: loop header
LB: loop body
LE: loop exit
PB: predicated region body
PF: predicated region fallthrough
CT: control target
= control target key end

     0   :  { %11 = vsyncpa [#allocation3], 0  ;;  %s1969_s0 = inlined_call_operand.vmem [shape: bf16[768,64], index: 0, kind: input, shape index: {}]   ;;  %s1970_s1 = inlined_call_operand.vmem [shape: bf16[64,128], index: 1, kind: input, shape index: {}]   ;;  %s1971_s2 = inlined_call_operand.vmem [shape: bf16[64,128], index: 2, kind: input, shape index: {}]   ;;  %s1972_s3 = inlined_call_operand.vmem [shape: f32[1,128], index: 3, kind: input, shape index: {}]   ;;  %s1973_s4 = inlined_call_operand.hbm [shape: bf16[768,128], index: 4, kind: output, shape index: {0}]   ;;  %s1974_s5 = inlined_call_operand.hbm [shape: f32[768,128], index: 5, kind: output, shape index: {1}]  }
   0x1   :  { %13 = vsyncpa [#allocation3 + $0x1], 0 }
   0x2   :  { %14 = vsyncpa [#allocation5], 0 }
   0x3   :  { %16 = vsyncpa [#allocation5 + $0x1], 0  ;;  %s1668_s18 = smov 0   ;;  %s1670_s19 = smov 0  }
   0x4   :  { %s1672_s20 = smov 0   ;;  %s1674_s21 = smov 0  }
   0x5 LB: > { %s1689_s22 = sadd.s32 4294967295, %s1630_s21   ;;  %s1114_s23 = sadd.s32 4294967294, %s1630_s21   ;;  %s1630_s21 = sphi %s1674_s21, %s1980_s21   ;;  %s1626_s20 = sphi %s1672_s20, %s1979_s20   ;;  %s1622_s19 = sphi %s1670_s19, %s1978_s19   ;;  %s1618_s18 = sphi %s1668_s18, %s1977_s18  }
   0x6   : > { %s1693_s24 = sadd.s32 1, %s1630_s21   ;;  %s118_s25 = sadd.s32 1, %s1626_s20 }
   0x7   : > { %s115_s26 = ssub.s32 %s1630_s21, %s1693_s24  ;;  %p128_p0 = scmp.ne.s32.totalorder %s1626_s20, %s1622_s19 }
   0x8   : > { %p116_p1 = scmp.eq.s32.totalorder %s115_s26, 0  ;;  %p129_p2 = scmp.eq.s32.totalorder %s1689_s22, 2 }
   0x9   : > { %p134_p3 = scmp.ne.s32.totalorder %s1622_s19, %s1618_s18  ;;  %p135_p4 = scmp.eq.s32.totalorder %s1114_s23, 2 }
   0xa   : > { %s1704_s27 = scalar_select %p116_p1, %s1626_s20, %s118_s25  }
   0xb   : > { %p1706_p5 = por %p129_p2, %p128_p0  ;;  %p1710_p6 = por %p135_p4, %p134_p3 }
   0xc   : > { %p1117_p7 = scmp.ge.s32.totalorder %s1630_s21, 1  ;;  %p197_p8 = scmp.lt.s32.totalorder %s1630_s21, 4 }
   0xe   : > { %p198_p9 = pnand %p1117_p7, %p197_p8 }
   0xf   : > { %s1120_s7 = sshll.u32 (!%p198_p9), %s1689_s22, 5  ;;  %s1795_s10 = sand.u32 (!%p198_p9), 1, %s1622_s19  }
  0x10   : > { %201 = sbr.rel (%p198_p9) target bundleno = 333 (0x14d), region = 36  ;;  %p231_p10 = scmp.lt.s32.totalorder (!%p198_p9), %s1120_s7, 95 }
  0x11   : > { %s1119_s11 = sshll.u32 (!%p198_p9), %s1795_s10, 8  ;;  %s1118_s14 = sshll.u32 (!%p198_p9), %s1795_s10, 7 }
  0x12   : > { %s1805_s15 = scalar_lea.vmem (!%p198_p9), [#allocation4], %s1119_s11  ;;  %s1811_s16 = scalar_lea.vmem (!%p198_p9), [#allocation2], %s1118_s14 }
  0x13   : > { %s1251_s17 = sshll.u32 (!%p198_p9), %s1689_s22, 11  ;;  %s1252_s25 = sshll.u32 (!%p198_p9), %s1689_s22, 12 }
  0x14   : > { %s1020_s26 = sshll.u32 (!%p198_p9), %s1805_s15, 4  ;;  %s1888_s8 = scalar_lea.hbm (!%p198_p9), %s1973_s4, %s1251_s17  ;;  %s1900_s26 = int_to_ptr.vmem [resolvable:$true] %s1020_s26 }
  0x15   : > { %v1516_v0 = vld [vmem:[%s1970_s1 + $0x18] sm:$0xff]   ;;  %v1518_v2 = vld [vmem:[%s1970_s1 + $0x10] sm:$0xff]   ;;  %s1982_s7 = smov (!%p231_p10, %s1120_s7), 95  ;;  %v1520_v4 = vld [vmem:[%s1970_s1 + $0x8] sm:$0xff]   ;;  %vm383_vm0 = vcmask 523264   ;;  %s986_s11 = scalar_lea.sflag [#allocation3], %s1795_s10 }
  0x16   : > { %v1517_v1 = vld [vmem:[%s1971_s2 + $0x18] sm:$0xff]   ;;  %1388 = vmatprep.subr.bf16.mxu0 %v1516_v0  ;;  %v1519_v3 = vld [vmem:[%s1971_s2 + $0x10] sm:$0xff]   ;;  %v1521_v5 = vld [vmem:[%s1971_s2 + $0x8] sm:$0xff]   ;;  %s1121_s23 = sshll.u32 %s1982_s7, 2  ;;  %s1898_s7 = scalar_lea.hbm %s1974_s5, %s1252_s25 }
  0x17   : > { %1428 = vmatprep.subr.bf16.mxu1 %v1517_v1  ;;  %1389 = vmatpush3.bf16.msra.mxu0 %v1516_v0  ;;  %s1738_s30 = scalar_lea.vmem %s1969_s0, %s1121_s23  ;;  %v1522_v6 = vld [vmem:[%s1970_s1] sm:$0xff]   ;;  %s1004_s23 = sshll.u32 %s1811_s16, 4  ;;  %s1890_s23 = int_to_ptr.vmem [resolvable:$true] %s1004_s23 }
  0x18   : > { %1429 = vmatpush3.bf16.msra.mxu1 %v1517_v1  ;;  %1390 = vmatprep.subr.bf16.mxu0 %v1518_v2  ;;  %v1524_v7 = vld [vmem:[%s1738_s30] sm:$0xff]   ;;  %v1525_v9 = vld [vmem:[%s1738_s30 + $0x8] sm:$0xff]   ;;  %v1526_v10 = vld [vmem:[%s1738_s30 + $0x10] sm:$0xff]   ;;  %s1540_s12 = scalar_lea.vmem %s1890_s23, 2048  ;;  %s1632_s13 = smov [#allocation2]  }
  0x19   : > { %1430 = vmatprep.subr.bf16.mxu1 %v1519_v3  ;;  %v1523_v8 = vld [vmem:[%s1971_s2] sm:$0xff]   ;;  %1396 = vmatprep.mubr.msk.bf16.mxu0 %vm383_vm0, %v1524_v7  ;;  %v1527_v11 = vld [vmem:[%s1738_s30 + $0x18] sm:$0xff]   ;;  %v1529_v13 = vld [vmem:[%s1738_s30 + $0x28] sm:$0xff]   ;;  %p1541_p11 = scmp.ne.s32.totalorder %s1890_s23, %s1540_s12  ;;  %s1544_s14 = sshll.u32 %s1632_s13, 4  ;;  %s1545_s14 = int_to_ptr.vmem [resolvable:$false] %s1544_s14 }
  0x1a   : > { %1436 = vmatprep.mubr.msk.bf16.mxu1 %vm383_vm0, %v1524_v7  ;;  %v1528_v12 = vld [vmem:[%s1738_s30 + $0x20] sm:$0xff]   ;;  %v1530_v14 = vld [vmem:[%s1738_s30 + $0x30] sm:$0xff]   ;;  %v1531_v15 = vld [vmem:[%s1738_s30 + $0x38] sm:$0xff]   ;;  %s1546_s17 = scalar_lea.vmem %s1545_s14, 4096  ;;  %p1547_p0 = scmp.lt.s32.totalorder %s1890_s23, %s1545_s14 }
  0x1b   : > { %1391 = vmatpush3.bf16.msra.mxu0 %v1518_v2  ;;  %v1532_v16 = vld [vmem:[%s1738_s30 + $0x40] sm:$0xff]   ;;  %v1533_v17 = vld [vmem:[%s1738_s30 + $0x48] sm:$0xff]   ;;  %v1534_v18 = vld [vmem:[%s1738_s30 + $0x50] sm:$0xff]   ;;  %p1542_p12 = pnand %p1541_p11, %p1706_p5  ;;  %p1548_p1 = scmp.lt.s32.totalorder %s1546_s17, %s1540_s12 }
  0x1c   : > { %1431 = vmatpush3.bf16.msra.mxu1 %v1519_v3  ;;  %1392 = vmatprep.subr.bf16.mxu0 %v1520_v4  ;;  %v1535_v19 = vld [vmem:[%s1738_s30 + $0x58] sm:$0xff]   ;;  %v1536_v20 = vld [vmem:[%s1738_s30 + $0x60] sm:$0xff]   ;;  %v1537_v21 = vld [vmem:[%s1738_s30 + $0x68] sm:$0xff]  }
  0x1d   : > { %1432 = vmatprep.subr.bf16.mxu1 %v1521_v5  ;;  %v1538_v22 = vld [vmem:[%s1738_s30 + $0x70] sm:$0xff]   ;;  %v1539_v23 = vld [vmem:[%s1738_s30 + $0x78] sm:$0xff]   ;;  %v1801_v24 = vld [vmem:[%s1972_s3] ss:$0 sm:$0xff]  ;;  %p1543_p13 = pneg %p1542_p12  ;;  %p1549_p2 = por %p1548_p1, %p1547_p0 }
  0x1f   : > { %1393 = vmatpush3.bf16.msra.mxu0 %v1520_v4  ;;  %p1550_p3 = pnand %p1549_p2, %p1543_p13 }
  0x20   : > { %1433 = vmatpush3.bf16.msra.mxu1 %v1521_v5  ;;  %1394 = vmatprep.subr.bf16.mxu0 %v1522_v6 }
  0x21   : > { %1434 = vmatprep.subr.bf16.mxu1 %v1523_v8 }
  0x23   : > { %1395 = vmatpush3.bf16.msra.mxu0 %v1522_v6 }
  0x24   : > { %1435 = vmatpush3.bf16.msra.mxu1 %v1523_v8 }
  0x26   : > { %1397 = vmatmul.mubr.msk.bf16.vlgmr.msra.gmra.mxu0 %vm383_vm0, %v1525_v9 }
  0x27   : > { %1437 = vmatmul.mubr.msk.bf16.vlgmr.msra.gmra.mxu1 %vm383_vm0, %v1525_v9  ;;  %1400 = vmatprep.mubr.msk.bf16.mxu0 %vm383_vm0, %v1526_v10 }
  0x28   : > { %1440 = vmatprep.mubr.msk.bf16.mxu1 %vm383_vm0, %v1526_v10 }
  0x2e   : > { %1401 = vmatmul.mubr.msk.bf16.gmra.mxu0 %vm383_vm0, %v1527_v11 }
  0x2f   : > { %1441 = vmatmul.mubr.msk.bf16.gmra.mxu1 %vm383_vm0, %v1527_v11  ;;  %1404 = vmatprep.mubr.msk.bf16.mxu0 %vm383_vm0, %v1528_v12 }
  0x30   : > { %1444 = vmatprep.mubr.msk.bf16.mxu1 %vm383_vm0, %v1528_v12 }
  0x36   : > { %1405 = vmatmul.mubr.msk.bf16.gmra.mxu0 %vm383_vm0, %v1529_v13 }
  0x37   : > { %1445 = vmatmul.mubr.msk.bf16.gmra.mxu1 %vm383_vm0, %v1529_v13  ;;  %1408 = vmatprep.mubr.msk.bf16.mxu0 %vm383_vm0, %v1530_v14 }
  0x38   : > { %1448 = vmatprep.mubr.msk.bf16.mxu1 %vm383_vm0, %v1530_v14 }
  0x3e   : > { %1409 = vmatmul.mubr.msk.bf16.gmra.mxu0 %vm383_vm0, %v1531_v15 }
  0x3f   : > { %1449 = vmatmul.mubr.msk.bf16.gmra.mxu1 %vm383_vm0, %v1531_v15  ;;  %1412 = vmatprep.mubr.msk.bf16.mxu0 %vm383_vm0, %v1532_v16 }
  0x40   : > { %1452 = vmatprep.mubr.msk.bf16.mxu1 %vm383_vm0, %v1532_v16 }
  0x46   : > { %1413 = vmatmul.mubr.msk.bf16.gmra.mxu0 %vm383_vm0, %v1533_v17 }
  0x47   : > { %1453 = vmatmul.mubr.msk.bf16.gmra.mxu1 %vm383_vm0, %v1533_v17  ;;  %1416 = vmatprep.mubr.msk.bf16.mxu0 %vm383_vm0, %v1534_v18 }
  0x48   : > { %1456 = vmatprep.mubr.msk.bf16.mxu1 %vm383_vm0, %v1534_v18 }
  0x4e   : > { %1417 = vmatmul.mubr.msk.bf16.gmra.mxu0 %vm383_vm0, %v1535_v19 }
  0x4f   : > { %1457 = vmatmul.mubr.msk.bf16.gmra.mxu1 %vm383_vm0, %v1535_v19  ;;  %1420 = vmatprep.mubr.msk.bf16.mxu0 %vm383_vm0, %v1536_v20 }
  0x50   : > { %1460 = vmatprep.mubr.msk.bf16.mxu1 %vm383_vm0, %v1536_v20 }
  0x56   : > { %1421 = vmatmul.mubr.msk.bf16.gmra.mxu0 %vm383_vm0, %v1537_v21 }
  0x57   : > { %1461 = vmatmul.mubr.msk.bf16.gmra.mxu1 %vm383_vm0, %v1537_v21  ;;  %1424 = vmatprep.mubr.msk.bf16.mxu0 %vm383_vm0, %v1538_v22 }
  0x58   : > { %1464 = vmatprep.mubr.msk.bf16.mxu1 %vm383_vm0, %v1538_v22 }
  0x5e   : > { %1425 = vmatmul.mubr.msk.bf16.gmra.mxu0 %vm383_vm0, %v1539_v23 }
  0x5f   : > { %1465 = vmatmul.mubr.msk.bf16.gmra.mxu1 %vm383_vm0, %v1539_v23 }
  0xe6   : > { %v1398_v25 = vpop.f32.mrf.mxu0 }
  0xe7   : > { %v1438_v26 = vpop.f32.mrf.mxu1 }
  0xe8   : > { %v835_v27 = vadd.f32 %v1438_v26, %v1801_v24  ;;  %v466_v28 = vpop.f32.mrf.mxu0 }
  0xe9   : > { %v826_v29 = vpop.f32.mrf.mxu1 }
  0xea   : > { %955 = vst [vmem:[%s1805_s15 + $0x10] sm:$0xff] %v835_v27  ;;  %v827_v30 = vadd.f32 %v1801_v24, %v826_v29  ;;  %v1399_v31 = vpop.f32.mrf.mxu0 }
  0xeb   : > { %v1261_v32 = vpack.c.bf16 %v1399_v31, %v1398_v25  ;;  %v1439_v33 = vpop.f32.mrf.mxu1 }
  0xec   : > { %953 = vst [vmem:[%s1805_s15] sm:$0xff] %v827_v30  ;;  %v838_v34 = vadd.f32 %v1439_v33, %v1801_v24  ;;  %v469_v35 = vpop.f32.mrf.mxu0 }
  0xed   : > { %1333 = vst [vmem:[%s1811_s16 + $0x8] sm:$0xff] %v1261_v32   ;;  %v1256_v36 = vpack.c.bf16 %v469_v35, %v466_v28  ;;  %v829_v37 = vpop.f32.mrf.mxu1 }
  0xee   : > { %956 = vst [vmem:[%s1805_s15 + $0x18] sm:$0xff] %v838_v34  ;;  %v830_v38 = vadd.f32 %v1801_v24, %v829_v37  ;;  %v1402_v39 = vpop.f32.mrf.mxu0 }
  0xef   : > { %1257 = vst [vmem:[%s1811_s16] sm:$0xff] %v1256_v36   ;;  %v1442_v40 = vpop.f32.mrf.mxu1 }
  0xf0   : > { %954 = vst [vmem:[%s1805_s15 + $0x8] sm:$0xff] %v830_v38  ;;  %v851_v41 = vadd.f32 %v1442_v40, %v1801_v24  ;;  %v482_v42 = vpop.f32.mrf.mxu0 }
  0xf1   : > { %v842_v43 = vpop.f32.mrf.mxu1 }
  0xf2   : > { %959 = vst [vmem:[%s1805_s15 + $0x30] sm:$0xff] %v851_v41  ;;  %v843_v44 = vadd.f32 %v1801_v24, %v842_v43  ;;  %v1403_v45 = vpop.f32.mrf.mxu0 }
  0xf3   : > { %v1271_v46 = vpack.c.bf16 %v1403_v45, %v1402_v39  ;;  %v1443_v47 = vpop.f32.mrf.mxu1 }
  0xf4   : > { %957 = vst [vmem:[%s1805_s15 + $0x20] sm:$0xff] %v843_v44  ;;  %v854_v48 = vadd.f32 %v1443_v47, %v1801_v24  ;;  %v485_v49 = vpop.f32.mrf.mxu0 }
  0xf5   : > { %1335 = vst [vmem:[%s1811_s16 + $0x18] sm:$0xff] %v1271_v46   ;;  %v1266_v50 = vpack.c.bf16 %v485_v49, %v482_v42  ;;  %v845_v51 = vpop.f32.mrf.mxu1 }
  0xf6   : > { %960 = vst [vmem:[%s1805_s15 + $0x38] sm:$0xff] %v854_v48  ;;  %v846_v52 = vadd.f32 %v1801_v24, %v845_v51  ;;  %v1406_v53 = vpop.f32.mrf.mxu0 }
  0xf7   : > { %1334 = vst [vmem:[%s1811_s16 + $0x10] sm:$0xff] %v1266_v50   ;;  %v1446_v54 = vpop.f32.mrf.mxu1 }
  0xf8   : > { %958 = vst [vmem:[%s1805_s15 + $0x28] sm:$0xff] %v846_v52  ;;  %v867_v55 = vadd.f32 %v1446_v54, %v1801_v24  ;;  %v498_v56 = vpop.f32.mrf.mxu0 }
  0xf9   : > { %v858_v57 = vpop.f32.mrf.mxu1 }
  0xfa   : > { %963 = vst [vmem:[%s1805_s15 + $0x50] sm:$0xff] %v867_v55  ;;  %v859_v58 = vadd.f32 %v1801_v24, %v858_v57  ;;  %v1407_v59 = vpop.f32.mrf.mxu0 }
  0xfb   : > { %v1281_v60 = vpack.c.bf16 %v1407_v59, %v1406_v53  ;;  %v1447_v61 = vpop.f32.mrf.mxu1 }
  0xfc   : > { %961 = vst [vmem:[%s1805_s15 + $0x40] sm:$0xff] %v859_v58  ;;  %v870_v62 = vadd.f32 %v1447_v61, %v1801_v24  ;;  %v501_v63 = vpop.f32.mrf.mxu0 }
  0xfd   : > { %1337 = vst [vmem:[%s1811_s16 + $0x28] sm:$0xff] %v1281_v60   ;;  %v1276_v0 = vpack.c.bf16 %v501_v63, %v498_v56  ;;  %v861_v1 = vpop.f32.mrf.mxu1 }
  0xfe   : > { %964 = vst [vmem:[%s1805_s15 + $0x58] sm:$0xff] %v870_v62  ;;  %v862_v2 = vadd.f32 %v1801_v24, %v861_v1  ;;  %v1410_v3 = vpop.f32.mrf.mxu0 }
  0xff   : > { %1336 = vst [vmem:[%s1811_s16 + $0x20] sm:$0xff] %v1276_v0   ;;  %v1450_v4 = vpop.f32.mrf.mxu1 }
 0x100   : > { %962 = vst [vmem:[%s1805_s15 + $0x48] sm:$0xff] %v862_v2  ;;  %v883_v5 = vadd.f32 %v1450_v4, %v1801_v24  ;;  %v514_v6 = vpop.f32.mrf.mxu0 }
 0x101   : > { %v874_v7 = vpop.f32.mrf.mxu1 }
 0x102   : > { %967 = vst [vmem:[%s1805_s15 + $0x70] sm:$0xff] %v883_v5  ;;  %v875_v8 = vadd.f32 %v1801_v24, %v874_v7  ;;  %v1411_v9 = vpop.f32.mrf.mxu0 }
 0x103   : > { %v1291_v10 = vpack.c.bf16 %v1411_v9, %v1410_v3  ;;  %v1451_v11 = vpop.f32.mrf.mxu1 }
 0x104   : > { %965 = vst [vmem:[%s1805_s15 + $0x60] sm:$0xff] %v875_v8  ;;  %v886_v12 = vadd.f32 %v1451_v11, %v1801_v24  ;;  %v517_v13 = vpop.f32.mrf.mxu0 }
 0x105   : > { %1339 = vst [vmem:[%s1811_s16 + $0x38] sm:$0xff] %v1291_v10   ;;  %v1286_v14 = vpack.c.bf16 %v517_v13, %v514_v6  ;;  %v877_v15 = vpop.f32.mrf.mxu1 }
 0x106   : > { %968 = vst [vmem:[%s1805_s15 + $0x78] sm:$0xff] %v886_v12  ;;  %v878_v16 = vadd.f32 %v1801_v24, %v877_v15  ;;  %v1414_v17 = vpop.f32.mrf.mxu0 }
 0x107   : > { %1338 = vst [vmem:[%s1811_s16 + $0x30] sm:$0xff] %v1286_v14   ;;  %v1454_v18 = vpop.f32.mrf.mxu1 }
 0x108   : > { %966 = vst [vmem:[%s1805_s15 + $0x68] sm:$0xff] %v878_v16  ;;  %v899_v19 = vadd.f32 %v1454_v18, %v1801_v24  ;;  %v530_v20 = vpop.f32.mrf.mxu0 }
 0x109   : > { %v890_v21 = vpop.f32.mrf.mxu1 }
 0x10a   : > { %971 = vst [vmem:[%s1805_s15 + $0x90] sm:$0xff] %v899_v19  ;;  %v891_v22 = vadd.f32 %v1801_v24, %v890_v21  ;;  %v1415_v23 = vpop.f32.mrf.mxu0 }
 0x10b   : > { %v1301_v25 = vpack.c.bf16 %v1415_v23, %v1414_v17  ;;  %v1455_v26 = vpop.f32.mrf.mxu1 }
 0x10c   : > { %969 = vst [vmem:[%s1805_s15 + $0x80] sm:$0xff] %v891_v22  ;;  %v902_v27 = vadd.f32 %v1455_v26, %v1801_v24  ;;  %v533_v28 = vpop.f32.mrf.mxu0 }
 0x10d   : > { %1341 = vst [vmem:[%s1811_s16 + $0x48] sm:$0xff] %v1301_v25   ;;  %v1296_v29 = vpack.c.bf16 %v533_v28, %v530_v20  ;;  %v893_v30 = vpop.f32.mrf.mxu1 }
 0x10e   : > { %972 = vst [vmem:[%s1805_s15 + $0x98] sm:$0xff] %v902_v27  ;;  %v894_v31 = vadd.f32 %v1801_v24, %v893_v30  ;;  %v1418_v32 = vpop.f32.mrf.mxu0 }
 0x10f   : > { %1340 = vst [vmem:[%s1811_s16 + $0x40] sm:$0xff] %v1296_v29   ;;  %v1458_v33 = vpop.f32.mrf.mxu1 }
 0x110   : > { %970 = vst [vmem:[%s1805_s15 + $0x88] sm:$0xff] %v894_v31  ;;  %v915_v34 = vadd.f32 %v1458_v33, %v1801_v24  ;;  %v546_v35 = vpop.f32.mrf.mxu0 }
 0x111   : > { %v906_v36 = vpop.f32.mrf.mxu1 }
 0x112   : > { %975 = vst [vmem:[%s1805_s15 + $0xb0] sm:$0xff] %v915_v34  ;;  %v907_v37 = vadd.f32 %v1801_v24, %v906_v36  ;;  %v1419_v38 = vpop.f32.mrf.mxu0 }
 0x113   : > { %v1311_v39 = vpack.c.bf16 %v1419_v38, %v1418_v32  ;;  %v1459_v40 = vpop.f32.mrf.mxu1 }
 0x114   : > { %973 = vst [vmem:[%s1805_s15 + $0xa0] sm:$0xff] %v907_v37  ;;  %v918_v41 = vadd.f32 %v1459_v40, %v1801_v24  ;;  %v549_v42 = vpop.f32.mrf.mxu0 }
 0x115   : > { %1343 = vst [vmem:[%s1811_s16 + $0x58] sm:$0xff] %v1311_v39   ;;  %v1306_v43 = vpack.c.bf16 %v549_v42, %v546_v35  ;;  %v909_v44 = vpop.f32.mrf.mxu1 }
 0x116   : > { %976 = vst [vmem:[%s1805_s15 + $0xb8] sm:$0xff] %v918_v41  ;;  %v910_v45 = vadd.f32 %v1801_v24, %v909_v44  ;;  %v1422_v46 = vpop.f32.mrf.mxu0 }
 0x117   : > { %1342 = vst [vmem:[%s1811_s16 + $0x50] sm:$0xff] %v1306_v43   ;;  %v1462_v47 = vpop.f32.mrf.mxu1 }
 0x118   : > { %974 = vst [vmem:[%s1805_s15 + $0xa8] sm:$0xff] %v910_v45  ;;  %v931_v48 = vadd.f32 %v1462_v47, %v1801_v24  ;;  %v562_v49 = vpop.f32.mrf.mxu0 }
 0x119   : > { %v922_v50 = vpop.f32.mrf.mxu1 }
 0x11a   : > { %979 = vst [vmem:[%s1805_s15 + $0xd0] sm:$0xff] %v931_v48  ;;  %v923_v51 = vadd.f32 %v1801_v24, %v922_v50  ;;  %v1423_v52 = vpop.f32.mrf.mxu0 }
 0x11b   : > { %v1321_v53 = vpack.c.bf16 %v1423_v52, %v1422_v46  ;;  %v1463_v54 = vpop.f32.mrf.mxu1 }
 0x11c   : > { %977 = vst [vmem:[%s1805_s15 + $0xc0] sm:$0xff] %v923_v51  ;;  %v934_v55 = vadd.f32 %v1463_v54, %v1801_v24  ;;  %v565_v56 = vpop.f32.mrf.mxu0 }
 0x11d   : > { %1345 = vst [vmem:[%s1811_s16 + $0x68] sm:$0xff] %v1321_v53   ;;  %v1316_v57 = vpack.c.bf16 %v565_v56, %v562_v49  ;;  %v925_v58 = vpop.f32.mrf.mxu1 }
 0x11e   : > { %980 = vst [vmem:[%s1805_s15 + $0xd8] sm:$0xff] %v934_v55  ;;  %v926_v59 = vadd.f32 %v1801_v24, %v925_v58  ;;  %v1426_v60 = vpop.f32.mrf.mxu0 }
 0x11f   : > { %1344 = vst [vmem:[%s1811_s16 + $0x60] sm:$0xff] %v1316_v57   ;;  %v1466_v61 = vpop.f32.mrf.mxu1 }
 0x120   : > { %978 = vst [vmem:[%s1805_s15 + $0xc8] sm:$0xff] %v926_v59  ;;  %v947_v62 = vadd.f32 %v1466_v61, %v1801_v24  ;;  %v578_v63 = vpop.f32.mrf.mxu0 }
 0x121   : > { %v938_v0 = vpop.f32.mrf.mxu1 }
 0x122   : > { %983 = vst [vmem:[%s1805_s15 + $0xf0] sm:$0xff] %v947_v62  ;;  %v939_v1 = vadd.f32 %v1801_v24, %v938_v0  ;;  %v1427_v2 = vpop.f32.mrf.mxu0 }
 0x123   : > { %v1331_v3 = vpack.c.bf16 %v1427_v2, %v1426_v60  ;;  %v1467_v4 = vpop.f32.mrf.mxu1 }
 0x124   : > { %981 = vst [vmem:[%s1805_s15 + $0xe0] sm:$0xff] %v939_v1  ;;  %v950_v5 = vadd.f32 %v1467_v4, %v1801_v24  ;;  %v581_v6 = vpop.f32.mrf.mxu0 }
 0x125   : > { %1347 = vst [vmem:[%s1811_s16 + $0x78] sm:$0xff] %v1331_v3   ;;  %v1326_v7 = vpack.c.bf16 %v581_v6, %v578_v63  ;;  %v941_v8 = vpop.f32.mrf.mxu1 }
 0x126   : > { %984 = vst [vmem:[%s1805_s15 + $0xf8] sm:$0xff] %v950_v5  ;;  %v942_v9 = vadd.f32 %v1801_v24, %v941_v8 }
 0x127   : > { %1346 = vst [vmem:[%s1811_s16 + $0x70] sm:$0xff] %v1326_v7  }
 0x128   : > { %982 = vst [vmem:[%s1805_s15 + $0xe8] sm:$0xff] %v942_v9 }
 0x129   : > { %1553 = shalt.err (!%p1550_p3)
}
 0x12a   : > { %s1554_s15 = scalar_lea.hbm %s1888_s8, 2048  ;;  %s1558_s30 = scalar_lea.hbm %s1973_s4, 6144 }
 0x12b   : > { %p1555_p4 = scmp.ne.s32.totalorder %s1888_s8, %s1554_s15  ;;  %p1559_p9 = scmp.lt.s32.totalorder %s1888_s8, %s1973_s4 }
 0x12c   : > { %p1560_p10 = scmp.lt.s32.totalorder %s1558_s30, %s1554_s15 }
 0x12d   : > { %p1556_p7 = pnand %p1555_p4, %p1706_p5 }
 0x12e   : > { %p1561_p11 = por %p1560_p10, %p1559_p9 }
 0x12f   : > { %p1557_p8 = pneg %p1556_p7 }
 0x131   : > { %p1562_p12 = pnand %p1561_p11, %p1557_p8 }
 0x133   : > { %1565 = shalt.err (!%p1562_p12)
}
 0x134   : > { %s1633_s9 = smov 64   ;;  %s1634_s12 = smov 4  }
 0x135   : > { %1468 = dma.vmem_to_hbm [thread:$0]  (%p1706_p5), %s1890_s23, 2048, %s1888_s8, %s986_s11, %s1633_s9, %s1633_s9, %s1634_s12  }
 0x136   : > { %s991_s13 = scalar_lea.sflag [#allocation5], %s1795_s10  ;;  %s1566_s14 = scalar_lea.vmem %s1900_s26, 4096 }
 0x137   : > { %p1567_p13 = scmp.ne.s32.totalorder %s1900_s26, %s1566_s14  ;;  %s1635_s17 = smov [#allocation4]  }
 0x138   : > { %s1570_s15 = sshll.u32 %s1635_s17, 4  ;;  %s1571_s15 = int_to_ptr.vmem [resolvable:$false] %s1570_s15 }
 0x139   : > { %p1568_p0 = pnand %p1567_p13, %p1706_p5  ;;  %s1572_s16 = scalar_lea.vmem %s1571_s15, 8192 }
 0x13a   : > { %p1573_p2 = scmp.lt.s32.totalorder %s1900_s26, %s1571_s15  ;;  %p1574_p3 = scmp.lt.s32.totalorder %s1572_s16, %s1566_s14 }
 0x13b   : > { %p1569_p1 = pneg %p1568_p0 }
 0x13c   : > { %p1575_p4 = por %p1574_p3, %p1573_p2 }
 0x13e   : > { %p1576_p7 = pnand %p1575_p4, %p1569_p1 }
 0x140   : > { %1579 = shalt.err (!%p1576_p7)
}
 0x141   : > { %s1580_s23 = scalar_lea.hbm %s1898_s7, 4096  ;;  %s1584_s25 = scalar_lea.hbm %s1974_s5, 12288 }
 0x142   : > { %p1581_p8 = scmp.ne.s32.totalorder %s1898_s7, %s1580_s23  ;;  %p1585_p11 = scmp.lt.s32.totalorder %s1898_s7, %s1974_s5 }
 0x143   : > { %p1586_p12 = scmp.lt.s32.totalorder %s1584_s25, %s1580_s23 }
 0x144   : > { %p1582_p9 = pnand %p1581_p8, %p1706_p5 }
 0x145   : > { %p1587_p13 = por %p1586_p12, %p1585_p11 }
 0x146   : > { %p1583_p10 = pneg %p1582_p9 }
 0x148   : > { %p1588_p0 = pnand %p1587_p13, %p1583_p10 }
 0x14a   : > { %1591 = shalt.err (!%p1588_p0)
}
 0x14b   : > { %s1636_s22 = smov 128   ;;  %s1637_s9 = smov 8  }
 0x14c   : > { %1469 = dma.vmem_to_hbm [thread:$0]  (%p1706_p5), %s1900_s26, 4096, %s1898_s7, %s991_s13, %s1636_s22, %s1636_s22, %s1637_s9  }
 0x14d PF: > { %p1479_p1 = scmp.ge.s32.totalorder %s1630_s21, 2  ;;  %s1035_s12 = sand.u32 1, %s1618_s18  }
 0x14e   : > { %s1036_s14 = scalar_lea.sflag [#allocation3], %s1035_s12 }
 0x14f   : > { %p1473_p2 = pnand %p1479_p1, %p1710_p6 }
 0x151   : > { %p1474_p3 = pneg %p1473_p2 }
 0x153   : > { %1609 = dma.done.wait (%p1474_p3), %s1036_s14, 2048  }
 0x154   : > { %1611 = vsyncadd (%p1474_p3), %s1036_s14, 4294965248  ;;  %s1045_s17 = scalar_lea.sflag [#allocation5], %s1035_s12 }
 0x155   : > { %1613 = dma.done.wait (%p1474_p3), %s1045_s17, 4096  }
 0x156   : > { %1615 = vsyncadd (%p1474_p3), %s1045_s17, 4294963200  ;;  %p19_p5 = scmp.ge.s32.totalorder %s1693_s24, 5   ;;  %s1977_s18 = smov %s1622_s19 }
 0x157   : > { %s1978_s19 = smov %s1626_s20  ;;  %s1979_s20 = smov %s1704_s27 }
 0x158   : > { %s1980_s21 = smov %s1693_s24  ;;  %21 = sbr.rel (!%p19_p5) target bundleno = 5 (0x5), region = 88 }
 0x15d   :  { %1050 = vsyncpa [#allocation3], 1 }
 0x15e   :  { %1052 = vsyncpa [#allocation3 + $0x1], 1 }
 0x15f   :  { %1053 = vsyncpa [#allocation5], 1 }
 0x160   :  { %1055 = vsyncpa [#allocation5 + $0x1], 1 }

</bundles_post_ra>
